<compile_context>
chip_gen: v5e
topology: v5e:2x2
jax: 0.10.0
libtpu: 0.0.40
codegen_flags: <defaults>
</compile_context>

<pallas_src>
import functools

import jax
import jax.numpy as jnp
from jax import lax
from jax.experimental import pallas as pl
from jax.experimental.pallas import tpu as pltpu


def _ffn_kernel(x_ref, scale_ref, wa_ref, wg_ref, wd_ref, o_ref,
                xn_ref, acc_ref, *, eps):
    # x_ref:     (TM, D)   token tile (resident across the ff axis)
    # scale_ref: (1,  D)   RMSNorm scale
    # wa_ref:    (D, TF)   "a" half of the up-projection, ff tile f
    # wg_ref:    (D, TF)   "gate" half of the up-projection, ff tile f
    # wd_ref:    (TF, D)   down-projection rows for ff tile f
    # o_ref:     (TM, D)   output tile (resident across the ff axis)
    # xn_ref:    (TM, D)   cached normalized activations (scratch)
    # acc_ref:   (TM, D)   f32 accumulator (scratch)
    f = pl.program_id(1)
    nf = pl.num_programs(1)

    @pl.when(f == 0)
    def _init():
        xf = x_ref[...].astype(jnp.float32)
        mean_sq = jnp.mean(xf * xf, axis=-1, keepdims=True)
        s = scale_ref[...].astype(jnp.float32) * lax.rsqrt(mean_sq + eps)
        xn_ref[...] = (xf * s).astype(xn_ref.dtype)
        acc_ref[...] = jnp.zeros_like(acc_ref)

    xn = xn_ref[...]
    # Two half-width matmuls; SwiGLU fused immediately (no (TM, 2*TF) slab).
    a = jnp.dot(xn, wa_ref[...], preferred_element_type=jnp.float32)
    g = jnp.dot(xn, wg_ref[...], preferred_element_type=jnp.float32)
    sw = a * (g * lax.logistic(g))  # a * silu(gate), f32 elementwise
    acc_ref[...] += jnp.dot(sw.astype(wd_ref.dtype), wd_ref[...],
                            preferred_element_type=jnp.float32)

    @pl.when(f == nf - 1)
    def _finalize():
        o_ref[...] = (acc_ref[...] + x_ref[...].astype(jnp.float32)
                      ).astype(o_ref.dtype)


def feed_forward_block(x, rms_scale, w_up_t, w_down_t, *, eps=1e-6,
                       token_tile=None, ff_tile=None):
    """x: (B, S, d_model); rms_scale: (d_model,);
    w_up_t: (d_model, 2*d_ff); w_down_t: (d_ff, d_model)."""
    B, S, D = x.shape
    d_ff = w_down_t.shape[0]
    assert w_up_t.shape == (D, 2 * d_ff)
    assert w_down_t.shape == (d_ff, D)

    # Split the fused up-projection into its two halves.
    # Column ordering matches torch's chunk(2, dim=-1): first d_ff -> a,
    # last d_ff -> gate.
    w_a = w_up_t[:, :d_ff]
    w_gate = w_up_t[:, d_ff:]

    N = B * S
    x2d = x.reshape(N, D)
    scale2d = rms_scale.reshape(1, D)

    # ---- token tile: default 256, pad N up to a multiple of TM ----
    if token_tile is None:
        TM = 256 if N >= 256 else max(8, ((N + 7) // 8) * 8)
    else:
        TM = int(token_tile)
    assert TM % 8 == 0, "token tile must be a multiple of 8 (sublane)"
    n_pad = (-N) % TM
    if n_pad:
        x2d = jnp.pad(x2d, ((0, n_pad), (0, 0)))
    Np = N + n_pad

    # ---- d_ff tile: stream weights in TF-wide chunks ----
    if ff_tile is None:
        TF = next((t for t in (512, 256, 128) if d_ff % t == 0), d_ff)
    else:
        TF = int(ff_tile)
    assert d_ff % TF == 0, "ff tile must divide d_ff"

    # VMEM budget sized to the chosen tiles (double-buffered inputs/outputs
    # plus the two scratch buffers), with a floor/ceiling that stays safe on
    # v5e / v6e / v7x.
    bx = jnp.dtype(x.dtype).itemsize
    bw = jnp.dtype(w_up_t.dtype).itemsize
    vmem_bytes = (
        2 * TM * D * bx                              # x tile
        + 2 * D * jnp.dtype(rms_scale.dtype).itemsize
        + 2 * 2 * D * TF * bw                        # w_a + w_gate tiles
        + 2 * TF * D * bw                            # w_down tile
        + 2 * TM * D * bx                            # out tile
        + TM * D * bx                                # xn scratch
        + TM * D * 4                                 # f32 accumulator
    )
    vmem_limit = min(max(int(vmem_bytes * 1.5) + (4 << 20), 32 << 20), 56 << 20)

    kernel = functools.partial(_ffn_kernel, eps=eps)

    out2d = pl.pallas_call(
        kernel,
        out_shape=jax.ShapeDtypeStruct((Np, D), x.dtype),
        grid_spec=pltpu.PrefetchScalarGridSpec(
            num_scalar_prefetch=0,
            grid=(Np // TM, d_ff // TF),              # reduction (ff) axis last
            in_specs=[
                pl.BlockSpec((TM, D), lambda i, f: (i, 0)),   # x tokens
                pl.BlockSpec((1, D), lambda i, f: (0, 0)),    # rms scale
                pl.BlockSpec((D, TF), lambda i, f: (0, f)),   # W_a tile
                pl.BlockSpec((D, TF), lambda i, f: (0, f)),   # W_gate tile
                pl.BlockSpec((TF, D), lambda i, f: (f, 0)),   # W_down tile
            ],
            out_specs=pl.BlockSpec((TM, D), lambda i, f: (i, 0)),
            scratch_shapes=[
                pltpu.VMEM((TM, D), x.dtype),        # cached xn
                pltpu.VMEM((TM, D), jnp.float32),    # accumulator
            ],
        ),
        compiler_params=pltpu.CompilerParams(
            dimension_semantics=("parallel", "arbitrary"),
            vmem_limit_bytes=vmem_limit,
        ),
    )(x2d, scale2d, w_a, w_gate, w_down_t)

    if n_pad:
        out2d = out2d[:N]
    return out2d.reshape(B, S, D)


def _reference(x, rms_scale, w_up_t, w_down_t, eps=1e-6):
    hi = lax.Precision.HIGHEST
    xf = x.astype(jnp.float32)
    mean_sq = jnp.mean(xf * xf, axis=-1, keepdims=True)
    scale = rms_scale.astype(jnp.float32) * lax.rsqrt(mean_sq + eps)
    xn = xf * scale
    h = jnp.dot(xn, w_up_t.astype(jnp.float32), precision=hi)
    d_ff = w_down_t.shape[0]
    a, gate = h[..., :d_ff], h[..., d_ff:]
    sw = a * (gate * jax.nn.sigmoid(gate))
    out = jnp.dot(sw, w_down_t.astype(jnp.float32), precision=hi)
    return (out + xf).astype(x.dtype)


if __name__ == "__main__":
    # Small but lane-dense shapes (D multiple of 128).
    B, S, d_model, d_ff = 2, 8, 128, 256
    key = jax.random.PRNGKey(0)
    kx, kup, kdown = jax.random.split(key, 3)

    x = jax.random.normal(kx, (B, S, d_model), dtype=jnp.float32)
    rms_scale = jnp.ones((d_model,), dtype=jnp.float32)   # torch.ones init
    # LinearSwiGLU weight: torch (2*d_ff, d_model); we pass the transpose.
    w_up_t = (jax.random.normal(kup, (d_model, 2 * d_ff), dtype=jnp.float32)
              * (1.0 / jnp.sqrt(d_model)))
    # down_proj weight: torch (d_model, d_ff); transpose.  (torch zero-inits;
    # random here so the kernel math is exercised.)
    w_down_t = (jax.random.normal(kdown, (d_ff, d_model), dtype=jnp.float32)
                * (1.0 / jnp.sqrt(d_ff)))

    ref = _reference(x, rms_scale, w_up_t, w_down_t)

    # Multi-tile path: 2 token tiles x 2 ff tiles (exercises the accumulator).
    out = feed_forward_block(x, rms_scale, w_up_t, w_down_t,
                             token_tile=8, ff_tile=128)
    out = jax.block_until_ready(out)
    assert out.shape == (B, S, d_model)
    assert jnp.allclose(out, ref, atol=2e-3, rtol=2e-3), "mismatch vs reference"

    # Default-tile path.
    out2 = jax.block_until_ready(
        feed_forward_block(x, rms_scale, w_up_t, w_down_t))
    assert jnp.allclose(out2, ref, atol=2e-3, rtol=2e-3), "mismatch (default tiles)"

    print("KERNEL_OK")
</pallas_src>

<mosaic_0001>
module attributes {stable_mosaic.version = 11 : i64} {
  func.func @_ffn_kernel(%arg0: i32, %arg1: i32, %arg2: memref<8x128xf32, #tpu.memory_space<vmem>>, %arg3: memref<1x128xf32, #tpu.memory_space<vmem>>, %arg4: memref<128x128xf32, #tpu.memory_space<vmem>>, %arg5: memref<128x128xf32, #tpu.memory_space<vmem>>, %arg6: memref<128x128xf32, #tpu.memory_space<vmem>>, %arg7: memref<8x128xf32, #tpu.memory_space<vmem>>, %arg8: memref<8x128xf32, #tpu.memory_space<vmem>>, %arg9: memref<8x128xf32, #tpu.memory_space<vmem>>) attributes {dimension_semantics = [#tpu.dimension_semantics<parallel>, #tpu.dimension_semantics<arbitrary>], iteration_bounds = array<i64: 2, 2>, scalar_prefetch = 0 : i64, scratch_operands = 2 : i64, tpu.core_type = #tpu.core_type<tc>, window_params = [{transform_indices = @transform_0, window_bounds = array<i64: 8, 128>}, {pipeline_mode = #tpu.pipeline_mode<synchronous>, transform_indices = @transform_1, window_bounds = array<i64: 1, 128>}, {transform_indices = @transform_2, window_bounds = array<i64: 128, 128>}, {transform_indices = @transform_3, window_bounds = array<i64: 128, 128>}, {transform_indices = @transform_4, window_bounds = array<i64: 128, 128>}, {transform_indices = @transform_5, window_bounds = array<i64: 8, 128>}]} {
    %c0_i32 = arith.constant 0 : i32
    %0 = arith.cmpi eq, %arg1, %c0_i32 : i32
    %1 = arith.extui %0 : i1 to i32
    %c0_i32_0 = arith.constant 0 : i32
    %2 = arith.cmpi ne, %1, %c0_i32_0 : i32
    scf.if %2 {
      %c0_16 = arith.constant 0 : index
      %c0_17 = arith.constant 0 : index
      %23 = vector.load %arg2[%c0_16, %c0_17] : memref<8x128xf32, #tpu.memory_space<vmem>>, vector<8x128xf32>
      %24 = arith.mulf %23, %23 : vector<8x128xf32>
      %cst_18 = arith.constant dense<0.000000e+00> : vector<8xf32>
      %25 = vector.multi_reduction <add>, %24, %cst_18 [1] : vector<8x128xf32> to vector<8xf32>
      %26 = vector.shape_cast %25 : vector<8xf32> to vector<8x1xf32>
      %cst_19 = arith.constant 1.280000e+02 : f32
      %27 = vector.broadcast %cst_19 : f32 to vector<8x1xf32>
      %28 = arith.divf %26, %27 : vector<8x1xf32>
      %c0_20 = arith.constant 0 : index
      %c0_21 = arith.constant 0 : index
      %29 = vector.load %arg3[%c0_20, %c0_21] : memref<1x128xf32, #tpu.memory_space<vmem>>, vector<1x128xf32>
      %cst_22 = arith.constant 9.99999997E-7 : f32
      %30 = vector.broadcast %cst_22 : f32 to vector<8x1xf32>
      %31 = arith.addf %28, %30 : vector<8x1xf32>
      %32 = math.rsqrt %31 : vector<8x1xf32>
      %33 = vector.broadcast %29 : vector<1x128xf32> to vector<8x128xf32>
      %34 = vector.broadcast %32 : vector<8x1xf32> to vector<8x128xf32>
      %35 = arith.mulf %33, %34 : vector<8x128xf32>
      %36 = arith.mulf %23, %35 : vector<8x128xf32>
      %c0_23 = arith.constant 0 : index
      %c0_24 = arith.constant 0 : index
      %37 = vector.load %arg8[%c0_23, %c0_24] : memref<8x128xf32, #tpu.memory_space<vmem>>, vector<8x128xf32>
      tpu.vector_store %arg8[%c0_23, %c0_24], %36 {strides = array<i32>} : memref<8x128xf32, #tpu.memory_space<vmem>>, vector<8x128xf32>,
      %cst_25 = arith.constant 0.000000e+00 : f32
      %38 = vector.broadcast %cst_25 : f32 to vector<8x128xf32>
      %c0_26 = arith.constant 0 : index
      %c0_27 = arith.constant 0 : index
      %39 = vector.load %arg9[%c0_26, %c0_27] : memref<8x128xf32, #tpu.memory_space<vmem>>, vector<8x128xf32>
      tpu.vector_store %arg9[%c0_26, %c0_27], %38 {strides = array<i32>} : memref<8x128xf32, #tpu.memory_space<vmem>>, vector<8x128xf32>,
    } else {
    }
    %c0 = arith.constant 0 : index
    %c0_1 = arith.constant 0 : index
    %3 = vector.load %arg8[%c0, %c0_1] : memref<8x128xf32, #tpu.memory_space<vmem>>, vector<8x128xf32>
    %c0_2 = arith.constant 0 : index
    %c0_3 = arith.constant 0 : index
    %4 = vector.load %arg4[%c0_2, %c0_3] : memref<128x128xf32, #tpu.memory_space<vmem>>, vector<128x128xf32>
    %cst = arith.constant dense<0.000000e+00> : vector<8x128xf32>
    %5 = tpu.matmul %3, %4, %cst {dimension_numbers = #tpu.dot_dimension_numbers<[1], [0], [0], [1], [0, 0, 1, 1], [], []>} : vector<8x128xf32>, vector<128x128xf32>, vector<8x128xf32> -> vector<8x128xf32>
    %c0_4 = arith.constant 0 : index
    %c0_5 = arith.constant 0 : index
    %6 = vector.load %arg5[%c0_4, %c0_5] : memref<128x128xf32, #tpu.memory_space<vmem>>, vector<128x128xf32>
    %cst_6 = arith.constant dense<0.000000e+00> : vector<8x128xf32>
    %7 = tpu.matmul %3, %6, %cst_6 {dimension_numbers = #tpu.dot_dimension_numbers<[1], [0], [0], [1], [0, 0, 1, 1], [], []>} : vector<8x128xf32>, vector<128x128xf32>, vector<8x128xf32> -> vector<8x128xf32>
    %8 = arith.negf %7 : vector<8x128xf32>
    %9 = math.exp %8 : vector<8x128xf32>
    %cst_7 = arith.constant 1.000000e+00 : f32
    %10 = vector.broadcast %cst_7 : f32 to vector<8x128xf32>
    %11 = arith.addf %10, %9 : vector<8x128xf32>
    %12 = arith.divf %10, %11 : vector<8x128xf32>
    %13 = arith.mulf %7, %12 : vector<8x128xf32>
    %14 = arith.mulf %5, %13 : vector<8x128xf32>
    %c0_8 = arith.constant 0 : index
    %c0_9 = arith.constant 0 : index
    %15 = vector.load %arg9[%c0_8, %c0_9] : memref<8x128xf32, #tpu.memory_space<vmem>>, vector<8x128xf32>
    %c0_10 = arith.constant 0 : index
    %c0_11 = arith.constant 0 : index
    %16 = vector.load %arg6[%c0_10, %c0_11] : memref<128x128xf32, #tpu.memory_space<vmem>>, vector<128x128xf32>
    %cst_12 = arith.constant dense<0.000000e+00> : vector<8x128xf32>
    %17 = tpu.matmul %14, %16, %cst_12 {dimension_numbers = #tpu.dot_dimension_numbers<[1], [0], [0], [1], [0, 0, 1, 1], [], []>} : vector<8x128xf32>, vector<128x128xf32>, vector<8x128xf32> -> vector<8x128xf32>
    %18 = arith.addf %15, %17 : vector<8x128xf32>
    %c0_13 = arith.constant 0 : index
    %c0_14 = arith.constant 0 : index
    %19 = vector.load %arg9[%c0_13, %c0_14] : memref<8x128xf32, #tpu.memory_space<vmem>>, vector<8x128xf32>
    tpu.vector_store %arg9[%c0_13, %c0_14], %18 {strides = array<i32>} : memref<8x128xf32, #tpu.memory_space<vmem>>, vector<8x128xf32>,
    %c1_i32 = arith.constant 1 : i32
    %20 = arith.cmpi eq, %arg1, %c1_i32 : i32
    %21 = arith.extui %20 : i1 to i32
    %c0_i32_15 = arith.constant 0 : i32
    %22 = arith.cmpi ne, %21, %c0_i32_15 : i32
    scf.if %22 {
      %c0_16 = arith.constant 0 : index
      %c0_17 = arith.constant 0 : index
      %23 = vector.load %arg9[%c0_16, %c0_17] : memref<8x128xf32, #tpu.memory_space<vmem>>, vector<8x128xf32>
      %c0_18 = arith.constant 0 : index
      %c0_19 = arith.constant 0 : index
      %24 = vector.load %arg2[%c0_18, %c0_19] : memref<8x128xf32, #tpu.memory_space<vmem>>, vector<8x128xf32>
      %25 = arith.addf %23, %24 : vector<8x128xf32>
      %c0_20 = arith.constant 0 : index
      %c0_21 = arith.constant 0 : index
      %26 = vector.load %arg7[%c0_20, %c0_21] : memref<8x128xf32, #tpu.memory_space<vmem>>, vector<8x128xf32>
      tpu.vector_store %arg7[%c0_20, %c0_21], %25 {strides = array<i32>} : memref<8x128xf32, #tpu.memory_space<vmem>>, vector<8x128xf32>,
    } else {
    }
    return
  }
  func.func @transform_0(%arg0: i32, %arg1: i32) -> (i32, i32) {
    %c0_i32 = arith.constant 0 : i32
    %c0_i32_0 = arith.constant 0 : i32
    return %arg0, %c0_i32 : i32, i32
  }
  func.func @transform_1(%arg0: i32, %arg1: i32) -> (i32, i32) {
    %c0_i32 = arith.constant 0 : i32
    %c0_i32_0 = arith.constant 0 : i32
    %c0_i32_1 = arith.constant 0 : i32
    return %c0_i32, %c0_i32_0 : i32, i32
  }
  func.func @transform_2(%arg0: i32, %arg1: i32) -> (i32, i32) {
    %c0_i32 = arith.constant 0 : i32
    %c0_i32_0 = arith.constant 0 : i32
    return %c0_i32, %arg1 : i32, i32
  }
  func.func @transform_3(%arg0: i32, %arg1: i32) -> (i32, i32) {
    %c0_i32 = arith.constant 0 : i32
    %c0_i32_0 = arith.constant 0 : i32
    return %c0_i32, %arg1 : i32, i32
  }
  func.func @transform_4(%arg0: i32, %arg1: i32) -> (i32, i32) {
    %c0_i32 = arith.constant 0 : i32
    %c0_i32_0 = arith.constant 0 : i32
    return %arg1, %c0_i32 : i32, i32
  }
  func.func @transform_5(%arg0: i32, %arg1: i32) -> (i32, i32) {
    %c0_i32 = arith.constant 0 : i32
    %c0_i32_0 = arith.constant 0 : i32
    return %arg0, %c0_i32 : i32, i32
  }
}

</mosaic_0001>

<bundles_post_ra>
// kernel: tpu_custom_call.1
= control target key start
LH: loop header
LB: loop body
LE: loop exit
PB: predicated region body
PF: predicated region fallthrough
CT: control target
= control target key end

     0   :  { %s1550_s0 = inlined_call_operand.hbm [shape: f32[16,128], index: 0, kind: input, shape index: {}]   ;;  %s1551_s1 = inlined_call_operand.hbm [shape: f32[1,128], index: 1, kind: input, shape index: {}]   ;;  %s1552_s2 = inlined_call_operand.hbm [shape: f32[128,256], index: 2, kind: input, shape index: {}]   ;;  %s1553_s3 = inlined_call_operand.hbm [shape: f32[128,256], index: 3, kind: input, shape index: {}]   ;;  %s1554_s4 = inlined_call_operand.hbm [shape: f32[256,128], index: 4, kind: input, shape index: {}]   ;;  %s1555_s5 = inlined_call_operand.hbm [shape: f32[16,128], index: 5, kind: output, shape index: {}]  }
   0x1   :  { %1562 = sst [smem:[#allocation22_spill]] %s1550_s0 }
   0x2   :  { %1563 = sst [smem:[#allocation23_spill]] %s1551_s1 }
   0x3   :  { %1564 = sst [smem:[#allocation24_spill]] %s1552_s2 }
   0x4   :  { %1565 = sst [smem:[#allocation25_spill]] %s1553_s3 }
   0x5   :  { %1566 = sst [smem:[#allocation26_spill]] %s1555_s5 }
   0x6   :  { %10 = vsyncpa [#allocation5], 0 }
   0x7   :  { %12 = vsyncpa [#allocation5 + $0x1], 0 }
   0x8   :  { %13 = vsyncpa [#allocation8], 0 }
   0x9   :  { %14 = vsyncpa [#allocation6], 0 }
   0xa   :  { %16 = vsyncpa [#allocation6 + $0x1], 0  ;;  %s1217_s18 = smov 0   ;;  %s1219_s19 = smov 0  }
   0xb   :  { %s1221_s20 = smov 0   ;;  %s1223_s21 = smov 0  }
   0xc   :  { %s1225_s22 = smov 0   ;;  %s1227_s23 = smov 0  }
   0xd   :  { %s1229_s24 = smov 0   ;;  %s1231_s25 = smov 0  }
   0xe   :  { %s1233_s26 = smov 0   ;;  %s1235_s27 = smov 0  }
   0xf   :  { %s1237_s28 = smov 0  }
  0x10 LB: > { %1567 = sst [smem:[#allocation17_spill]] %s1175_s27  ;;  %s729_s29 = sadd.s32 4294967294, %s1179_s28   ;;  %s1179_s28 = sphi %s1237_s28, %s22_s28   ;;  %s1175_s27 = sphi %s1235_s27, %s1600_s27   ;;  %s1171_s26 = sphi %s1233_s26, %s1599_s26   ;;  %s1167_s25 = sphi %s1231_s25, %s1589_s25   ;;  %s1163_s24 = sphi %s1229_s24, %s1598_s24   ;;  %s1159_s23 = sphi %s1227_s23, %s1597_s23   ;;  %s1155_s22 = sphi %s1225_s22, %s1596_s22   ;;  %s1151_s21 = sphi %s1223_s21, %s1595_s21   ;;  %s1147_s20 = sphi %s1221_s20, %s1594_s20   ;;  %s1143_s19 = sphi %s1219_s19, %s1593_s19   ;;  %s1139_s18 = sphi %s1217_s18, %s1592_s18  }
  0x11   : > { %s31_s30 = sadd.s32 1, %s1171_s26  ;;  %s34_s6 = sadd.s32 1, %s1175_s27 }
  0x12   : > { %p32_p0 = scmp.ge.s32.totalorder %s31_s30, 2  ;;  %s41_s7 = sadd.s32 1, %s1159_s23 }
  0x13   : > { %p48_p1 = scmp.ne.s32.totalorder %s1159_s23, %s1155_s22  ;;  %p49_p2 = scmp.eq.s32.totalorder %s1179_s28, 0 }
  0x14   : > { %s1602_s30 = smov (%p32_p0, %s31_s30), 0  ;;  %s1604_s6 = smov (!%p32_p0, %s34_s6), %s1175_s27 }
  0x15   : > { %1568 = sst [smem:[#allocation18_spill]] %s1602_s30  ;;  %p54_p3 = scmp.ne.s32.totalorder %s1155_s22, %s1151_s21 }
  0x16   : > { %p36_p4 = scmp.ge.s32.totalorder %s1604_s6, 2  ;;  %s85_s8 = ssub.s32 %s1171_s26, %s1602_s30 }
  0x17   : > { %p1289_p5 = por %p49_p2, %p48_p1  ;;  %p86_p6 = scmp.eq.s32.totalorder %s85_s8, 0 }
  0x18   : > { %s1606_s6 = smov (%p36_p4, %s1604_s6), 0  ;;  %s88_s10 = sadd.s32 1, %s1147_s20 }
  0x19   : > { %1570 = sst [smem:[#allocation19_spill]] %s1606_s6  ;;  %p95_p7 = scmp.ne.s32.totalorder %s1147_s20, %s1143_s19 }
  0x1a   : > { %s38_s11 = ssub.s32 %s1175_s27, %s1606_s6  ;;  %p183_p8 = scmp.eq.s32.totalorder %s729_s29, 3 }
  0x1b   : > { %p39_p9 = scmp.eq.s32.totalorder %s38_s11, 0  ;;  %p1300_p10 = por %p95_p7, %p49_p2 }
  0x1c   : > { %s1305_s13 = scalar_select %p86_p6, %s1147_s20, %s88_s10  }
  0x1d   : > { %s1308_s14 = scalar_select %p39_p9, %s1159_s23, %s41_s7  }
  0x1e   : > { %1572 = sst [smem:[#allocation20_spill]] %s1305_s13  ;;  %p1313_p11 = por %p183_p8, %p54_p3 }
  0x1f   : > { %1573 = sst [smem:[#allocation21_spill]] %s1308_s14  ;;  %p793_p12 = scmp.lt.s32.totalorder %s1179_s28, 4 }
  0x20   : > { %s215_s16 = sand.u32 1, %s1179_s28   ;;  %s217_s17 = sand.u32 1, %s1159_s23  }
  0x21   : > { %s733_s29 = sshll.u32 %s217_s17, 3  ;;  %s734_s8 = sshll.u32 %s1175_s27, 3 }
  0x22   : > { %s1575_s0 = sld [smem:[#allocation22_spill]]  ;;  %s219_s13 = scalar_lea.vmem [#allocation4], %s733_s29 }
  0x23   : > { %s227_s5 = sshll.u32 %s219_s13, 4  ;;  %p776_p13 = pnand %p793_p12, %p1289_p5  ;;  %s228_s5 = int_to_ptr.vmem [resolvable:$true] %s227_s5 }
  0x24   : > { %p1328_p0 = pnand %p793_p12, %p1300_p10  ;;  %s236_s14 = sand.u32 1, %s1147_s20  }
  0x25   : > { %s736_s17 = sshll.u32 %s1171_s26, 3  ;;  %s1334_s27 = scalar_lea.sflag [#allocation5], %s215_s16 }
  0x26   : > { %s1577_s2 = sld [smem:[#allocation24_spill]]  ;;  %p101_p2 = scmp.ne.s32.totalorder %s1143_s19, %s1139_s18 }
  0x27   : > { %s1578_s3 = sld [smem:[#allocation25_spill]]  ;;  %p730_p6 = scmp.ge.s32.totalorder %s1179_s28, 1 }
  0x28   : > { %s223_s30 = scalar_lea.hbm %s1575_s0, %s734_s8  ;;  %s1561_s8 = smov 8  }
  0x29   : > { %s225_s10 = sshll.u32 %s223_s30, 4  ;;  %s1337_s30 = sshll.u32 %s236_s14, 7  ;;  %s226_s10 = int_to_ptr.hbm [resolvable:$true] %s225_s10 }
  0x2a   : > { %778 = dma.hbm_to_vmem [thread:$0]  (!%p776_p13), %s226_s10, 128, %s228_s5, %s1334_s27  }
  0x2b   : > { %s238_s16 = scalar_lea.vmem [#allocation9], %s1337_s30  ;;  %s1181_s5 = smov 256  }
  0x2c   : > { %s242_s9 = scalar_lea.hbm %s1577_s2, %s736_s17  ;;  %s245_s29 = sshll.u32 %s238_s16, 4  ;;  %s246_s29 = int_to_ptr.vmem [resolvable:$true] %s245_s29 }
  0x2d   : > { %s243_s12 = sshll.u32 %s242_s9, 4  ;;  %s1560_s14 = smov 128   ;;  %s244_s12 = int_to_ptr.hbm [resolvable:$true] %s243_s12 }
  0x2e   : > { %781 = dma.hbm_to_vmem [thread:$0]  (!%p1328_p0), %s244_s12, 2048, %s246_s29, %s1334_s27, %s1181_s5, %s1560_s14, %s1561_s8  }
  0x2f   : > { %s263_s6 = scalar_lea.hbm %s1578_s3, %s736_s17  ;;  %s259_s9 = scalar_lea.vmem [#allocation10], %s1337_s30 }
  0x30   : > { %s264_s13 = sshll.u32 %s263_s6, 4  ;;  %s266_s16 = sshll.u32 %s259_s9, 4  ;;  %s265_s13 = int_to_ptr.hbm [resolvable:$true] %s264_s13  ;;  %s267_s16 = int_to_ptr.vmem [resolvable:$true] %s266_s16 }
  0x31   : > { %784 = dma.hbm_to_vmem [thread:$0]  (!%p1328_p0), %s265_s13, 2048, %s267_s16, %s1334_s27, %s1181_s5, %s1560_s14, %s1561_s8  }
  0x32   : > { %s1358_s0 = sadd.s32 4294967295, %s1179_s28   ;;  %p190_p7 = scmp.lt.s32.totalorder %s1179_s28, 5 }
  0x33   : > { %p55_p4 = scmp.eq.s32.totalorder %s1358_s0, 0  ;;  %p177_p5 = scmp.eq.s32.totalorder %s1358_s0, 3 }
  0x34   : > { %p1388_p12 = pnand %p730_p6, %p190_p7  ;;  %s1583_s1 = sld [smem:[#allocation23_spill]] }
  0x35   : > { %p1371_p8 = por %p55_p4, %p54_p3  ;;  %p1377_p9 = por %p101_p2, %p55_p4 }
  0x36   : > { %p1384_p10 = por %p177_p5, %p48_p1  ;;  %p771_p3 = pneg %p1388_p12 }
  0x37   : > { %s1184_s6 = smov [#allocation7]   ;;  %s756_s9 = sshll.u32 %s1171_s26, 7 }
  0x38   : > { %s204_s13 = sshll.u32 %s1184_s6, 4  ;;  %p772_p1 = pnand %p771_p3, %p55_p4  ;;  %s205_s13 = int_to_ptr.vmem [resolvable:$true] %s204_s13 }
  0x39   : > { %s285_s8 = scalar_lea.hbm %s1554_s4, %s756_s9  ;;  %s280_s5 = scalar_lea.vmem [#allocation11], %s1337_s30 }
  0x3a   : > { %s202_s10 = sshll.u32 %s1583_s1, 4  ;;  %s286_s2 = sshll.u32 %s285_s8, 4  ;;  %s203_s10 = int_to_ptr.hbm [resolvable:$true] %s202_s10  ;;  %s287_s2 = int_to_ptr.hbm [resolvable:$true] %s286_s2 }
  0x3b   : > { %774 = dma.hbm_to_vmem [thread:$0]  (!%p772_p1), %s203_s10, 16, %s205_s13, [#allocation8]  }
  0x3c   : > { %s288_s11 = sshll.u32 %s280_s5, 4  ;;  %s1584_s1 = smov 8   ;;  %s289_s11 = int_to_ptr.vmem [resolvable:$true] %s288_s11 }
  0x3d   : > { %s1585_s3 = smov 128   ;;  %300 = sbr.rel (%p1388_p12) target bundleno = 582 (0x246), region = 40 }
  0x3e   : > { %787 = dma.hbm_to_vmem [thread:$0]  (!%p1328_p0), %s287_s2, 2048, %s289_s11, %s1334_s27, %s1585_s3, %s1585_s3, %s1584_s1  }
  0x3f   : > { %s302_s14 = sand.u32 (!%p1388_p12), 1, %s1358_s0   ;;  %s304_s6 = sand.u32 (!%p1388_p12), 1, %s1155_s22  }
  0x40   : > { %s1416_s8 = sshll.u32 (!%p1388_p12), %s304_s6, 3  ;;  %s303_s30 = scalar_lea.sflag (!%p1388_p12), [#allocation5], %s302_s14 }
  0x41   : > { %s306_s10 = scalar_lea.vmem (!%p1388_p12), [#allocation4], %s1416_s8 }
  0x42   : > { %1122 = dma.done.wait (%p1371_p8), %s303_s30, 128  }
  0x43   : > { %1124 = vsyncadd (%p1371_p8), %s303_s30, 4294967168 }
  0x44   : > { %1126 = dma.done.wait (%p55_p4), [#allocation8], 16  }
  0x45   : > { %1128 = vsyncadd (%p55_p4), [#allocation8], 4294967280  ;;  %s319_s1 = sand.u32 1, %s1143_s19  }
  0x46   : > { %s745_s2 = sshll.u32 %s319_s1, 7 }
  0x47   : > { %s1428_s3 = scalar_lea.vmem [#allocation9], %s745_s2 }
  0x48   : > { %1130 = dma.done.wait (%p1377_p9), %s303_s30, 6144  }
  0x49   : > { %1132 = vsyncadd (%p1377_p9), %s303_s30, 4294961152  ;;  %s1434_s27 = scalar_lea.vmem [#allocation10], %s745_s2  ;;  %s1436_s7 = scalar_lea.vmem [#allocation11], %s745_s2 }
  0x4a   : > { %s383_s17 = scalar_lea.vmem [#allocation12], %s1416_s8  ;;  %p749_p13 = scmp.ne.s32.totalorder %s1163_s24, 0 }
  0x4c   : > { %388 = sbr.rel (%p749_p13) target bundleno = 227 (0xe3), region = 64 }
  0x51   : > { %v389_v0 = vld [vmem:[%s306_s10] sm:$0xff]  ;;  %v1185_v2 = vmov 128.0   ;;  %v1186_v8 = vmov 0.0   ;;  %v890_v18 = vld [vmem:[#allocation7] ss:$0 sm:$0xff] }
  0x52   : > { %v390_v1 = vmul.f32 %v389_v0, %v389_v0  ;;  %891 = vrcp.f32 %v1185_v2  ;;  %419 = vst [vmem:[#allocation3] sm:$0xff] %v1186_v8 }
  0x54   : > { %391 = vadd.xlane.f32.xlu0 %v390_v1 }
  0x58   : > { %v892_v3 = vpop.eup %891 }
  0x59   : > { %v394_v4 = vmul.f32 128.0, %v892_v3  ;;  %vm398_vm0 = vweird.f32 %v892_v3 }
  0x5b   : > { %v395_v5 = vsub.f32 1.0, %v394_v4 }
  0x5d   : > { %v396_v6 = vmul.f32 %v892_v3, %v395_v5 }
  0x5f   : > { %v397_v7 = vadd.f32 %v892_v3, %v396_v6 }
  0x61   : > { %v399_v9 = vsel %vm398_vm0, %v892_v3, %v397_v7 }
  0xc7   : > { %v392_v10 = vpop.xlane.xlu0 %391 }
  0xc8   : > { %v400_v11 = vmul.f32 %v399_v9, %v392_v10 }
  0xca   : > { %v402_v12 = vadd.f32 1e-06, %v400_v11 }
  0xcc   : > { %893 = vrsqrt.f32 %v402_v12  ;;  %vm409_vm2 = vweird.f32 %v402_v12 }
  0xd2   : > { %v894_v13 = vpop.eup %893 }
  0xd3   : > { %v404_v14 = vmul.f32 %v894_v13, %v402_v12  ;;  %vm410_vm1 = vweird.f32 %v894_v13 }
  0xd4   : > { %vm411_vm3 = vmor %vm409_vm2, %vm410_vm1 }
  0xd5   : > { %v405_v15 = vmul.f32 %v894_v13, %v404_v14 }
  0xd7   : > { %v406_v16 = vmul.f32 0.5, %v405_v15 }
  0xd9   : > { %v407_v17 = vsub.f32 1.5, %v406_v16 }
  0xdb   : > { %v408_v19 = vmul.f32 %v894_v13, %v407_v17 }
  0xdd   : > { %v412_v20 = vsel %vm411_vm3, %v894_v13, %v408_v19 }
  0xde   : > { %v416_v21 = vmul.f32 %v890_v18, %v412_v20 }
  0xe0   : > { %v417_v22 = vmul.f32 %v416_v21, %v389_v0 }
  0xe2   : > { %418 = vst [vmem:[#allocation2] sm:$0xff] %v417_v22 }
  0xe3 PF: > { %v472_v23 = vld [vmem:[%s1434_s27 + $0x78] sm:$0xff]  ;;  %v471_v24 = vld [vmem:[%s1434_s27 + $0x70] sm:$0xff]  ;;  %v470_v25 = vld [vmem:[%s1434_s27 + $0x68] sm:$0xff]  ;;  %p751_p0 = scmp.ne.s32.totalorder %s1163_s24, 1 }
  0xe4   : > { %473 = vmatpush.msra.mxu1 %v472_v23  ;;  %v469_v26 = vld [vmem:[%s1434_s27 + $0x60] sm:$0xff]  ;;  %v436_v27 = vld [vmem:[%s1428_s3 + $0x78] sm:$0xff]  ;;  %v435_v29 = vld [vmem:[%s1428_s3 + $0x70] sm:$0xff] }
  0xe5   : > { %v468_v28 = vld [vmem:[%s1434_s27 + $0x58] sm:$0xff]  ;;  %437 = vmatpush.msra.mxu0 %v436_v27  ;;  %v434_v30 = vld [vmem:[%s1428_s3 + $0x68] sm:$0xff]  ;;  %v467_v31 = vld [vmem:[%s1434_s27 + $0x50] sm:$0xff] }
  0xe6   : > { %474 = vmatpush.msra.mxu1 %v471_v24  ;;  %v433_v32 = vld [vmem:[%s1428_s3 + $0x60] sm:$0xff]  ;;  %v466_v33 = vld [vmem:[%s1434_s27 + $0x48] sm:$0xff]  ;;  %v432_v34 = vld [vmem:[%s1428_s3 + $0x58] sm:$0xff] }
  0xe7   : > { %438 = vmatpush.msra.mxu0 %v435_v29  ;;  %v465_v35 = vld [vmem:[%s1434_s27 + $0x40] sm:$0xff]  ;;  %v431_v36 = vld [vmem:[%s1428_s3 + $0x50] sm:$0xff]  ;;  %v464_v37 = vld [vmem:[%s1434_s27 + $0x38] sm:$0xff] }
  0xe8   : > { %475 = vmatpush.msra.mxu1 %v470_v25  ;;  %v430_v38 = vld [vmem:[%s1428_s3 + $0x48] sm:$0xff]  ;;  %v463_v39 = vld [vmem:[%s1434_s27 + $0x30] sm:$0xff]  ;;  %v429_v40 = vld [vmem:[%s1428_s3 + $0x40] sm:$0xff] }
  0xe9   : > { %439 = vmatpush.msra.mxu0 %v434_v30  ;;  %v462_v41 = vld [vmem:[%s1434_s27 + $0x28] sm:$0xff]  ;;  %v428_v42 = vld [vmem:[%s1428_s3 + $0x38] sm:$0xff]  ;;  %v461_v43 = vld [vmem:[%s1434_s27 + $0x20] sm:$0xff] }
  0xea   : > { %476 = vmatpush.msra.mxu1 %v469_v26  ;;  %v427_v44 = vld [vmem:[%s1428_s3 + $0x30] sm:$0xff]  ;;  %v460_v45 = vld [vmem:[%s1434_s27 + $0x18] sm:$0xff]  ;;  %v426_v46 = vld [vmem:[%s1428_s3 + $0x28] sm:$0xff] }
  0xeb   : > { %440 = vmatpush.msra.mxu0 %v433_v32  ;;  %v459_v47 = vld [vmem:[%s1434_s27 + $0x10] sm:$0xff]  ;;  %v425_v48 = vld [vmem:[%s1428_s3 + $0x20] sm:$0xff]  ;;  %v458_v49 = vld [vmem:[%s1434_s27 + $0x8] sm:$0xff] }
  0xec   : > { %477 = vmatpush.msra.mxu1 %v468_v28  ;;  %v424_v50 = vld [vmem:[%s1428_s3 + $0x18] sm:$0xff]  ;;  %v457_v51 = vld [vmem:[%s1434_s27] sm:$0xff]  ;;  %v423_v53 = vld [vmem:[%s1428_s3 + $0x10] sm:$0xff] }
  0xed   : > { %441 = vmatpush.msra.mxu0 %v432_v34  ;;  %v420_v52 = vld [vmem:[#allocation2] sm:$0xff]  ;;  %v422_v54 = vld [vmem:[%s1428_s3 + $0x8] sm:$0xff]  ;;  %v529_v57 = vld [vmem:[%s1436_s7 + $0x70] sm:$0xff] }
  0xee   : > { %478 = vmatpush.msra.mxu1 %v467_v31  ;;  %v421_v55 = vld [vmem:[%s1428_s3] sm:$0xff]  ;;  %v530_v56 = vld [vmem:[%s1436_s7 + $0x78] sm:$0xff]  ;;  %v528_v58 = vld [vmem:[%s1436_s7 + $0x68] sm:$0xff] }
  0xef   : > { %442 = vmatpush.msra.mxu0 %v431_v36  ;;  %531 = vmatpush.msra.mxu2 %v530_v56  ;;  %v527_v59 = vld [vmem:[%s1436_s7 + $0x60] sm:$0xff]  ;;  %v526_v60 = vld [vmem:[%s1436_s7 + $0x58] sm:$0xff]  ;;  %v525_v61 = vld [vmem:[%s1436_s7 + $0x50] sm:$0xff] }
  0xf0   : > { %479 = vmatpush.msra.mxu1 %v466_v33  ;;  %v524_v62 = vld [vmem:[%s1436_s7 + $0x48] sm:$0xff]  ;;  %v523_v63 = vld [vmem:[%s1436_s7 + $0x40] sm:$0xff]  ;;  %v522_v0 = vld [vmem:[%s1436_s7 + $0x38] sm:$0xff] }
  0xf1   : > { %443 = vmatpush.msra.mxu0 %v430_v38  ;;  %532 = vmatpush.msra.mxu2 %v529_v57  ;;  %v521_v1 = vld [vmem:[%s1436_s7 + $0x30] sm:$0xff]  ;;  %v520_v2 = vld [vmem:[%s1436_s7 + $0x28] sm:$0xff]  ;;  %v519_v3 = vld [vmem:[%s1436_s7 + $0x20] sm:$0xff] }
  0xf2   : > { %480 = vmatpush.msra.mxu1 %v465_v35  ;;  %v518_v4 = vld [vmem:[%s1436_s7 + $0x18] sm:$0xff]  ;;  %v517_v5 = vld [vmem:[%s1436_s7 + $0x10] sm:$0xff]  ;;  %v516_v6 = vld [vmem:[%s1436_s7 + $0x8] sm:$0xff] }
  0xf3   : > { %444 = vmatpush.msra.mxu0 %v429_v40  ;;  %533 = vmatpush.msra.mxu2 %v528_v58  ;;  %v515_v7 = vld [vmem:[%s1436_s7] sm:$0xff] }
  0xf4   : > { %481 = vmatpush.msra.mxu1 %v464_v37  ;;  %v514_v25 = vld [vmem:[#allocation3] sm:$0xff] }
  0xf5   : > { %445 = vmatpush.msra.mxu0 %v428_v42  ;;  %534 = vmatpush.msra.mxu2 %v527_v59 }
  0xf6   : > { %482 = vmatpush.msra.mxu1 %v463_v39 }
  0xf7   : > { %446 = vmatpush.msra.mxu0 %v427_v44  ;;  %535 = vmatpush.msra.mxu2 %v526_v60 }
  0xf8   : > { %483 = vmatpush.msra.mxu1 %v462_v41 }
  0xf9   : > { %447 = vmatpush.msra.mxu0 %v426_v46  ;;  %536 = vmatpush.msra.mxu2 %v525_v61 }
  0xfa   : > { %484 = vmatpush.msra.mxu1 %v461_v43 }
  0xfb   : > { %448 = vmatpush.msra.mxu0 %v425_v48  ;;  %537 = vmatpush.msra.mxu2 %v524_v62 }
  0xfc   : > { %485 = vmatpush.msra.mxu1 %v460_v45 }
  0xfd   : > { %449 = vmatpush.msra.mxu0 %v424_v50  ;;  %538 = vmatpush.msra.mxu2 %v523_v63 }
  0xfe   : > { %486 = vmatpush.msra.mxu1 %v459_v47 }
  0xff   : > { %450 = vmatpush.msra.mxu0 %v423_v53  ;;  %539 = vmatpush.msra.mxu2 %v522_v0 }
 0x100   : > { %487 = vmatpush.msra.mxu1 %v458_v49 }
 0x101   : > { %451 = vmatpush.msra.mxu0 %v422_v54  ;;  %540 = vmatpush.msra.mxu2 %v521_v1 }
 0x102   : > { %488 = vmatpush.msra.mxu1 %v457_v51 }
 0x103   : > { %489 = vmatmul.f32.vlgmr.msra.gmra.mxu1 %v420_v52  ;;  %452 = vmatpush.msra.mxu0 %v421_v55 }
 0x104   : > { %453 = vmatmul.f32.vlgmr.msra.gmra.mxu0 %v420_v52  ;;  %541 = vmatpush.msra.mxu2 %v520_v2 }
 0x106   : > { %542 = vmatpush.msra.mxu2 %v519_v3 }
 0x108   : > { %543 = vmatpush.msra.mxu2 %v518_v4 }
 0x10a   : > { %544 = vmatpush.msra.mxu2 %v517_v5 }
 0x10c   : > { %545 = vmatpush.msra.mxu2 %v516_v6 }
 0x10e   : > { %546 = vmatpush.msra.mxu2 %v515_v7 }
 0x180   : > { %v490_v8 = vpop.f32.mrf.mxu1 }
 0x181   : > { %v750_v9 = vmul.f32 -1.442695, %v490_v8  ;;  %v454_v22 = vpop.f32.mrf.mxu0 }
 0x183   : > { %895 = vpow2.f32 %v750_v9 }
 0x189   : > { %v896_v10 = vpop.eup %895 }
 0x18a   : > { %v496_v11 = vadd.f32 1.0, %v896_v10 }
 0x18c   : > { %897 = vrcp.f32 %v496_v11  ;;  %v508_v15 = vand.u32 2147483648, %v496_v11  ;;  %v506_v17 = vand.u32 2147483647, %v496_v11  ;;  %vm502_vm5 = vweird.f32 %v496_v11 }
 0x18e   : > { %v509_v19 = vor.u32 1.1754944e-38, %v508_v15  ;;  %vm507_vm7 = vcmp.eq.f32.partialorder %v506_v17, 8.507059e+37 }
 0x192   : > { %v898_v12 = vpop.eup %897 }
 0x193   : > { %v498_v13 = vmul.f32 %v898_v12, %v496_v11  ;;  %vm503_vm4 = vweird.f32 %v898_v12 }
 0x194   : > { %vm504_vm6 = vmor %vm502_vm5, %vm503_vm4 }
 0x195   : > { %v499_v14 = vsub.f32 1.0, %v498_v13 }
 0x197   : > { %v500_v16 = vmul.f32 %v898_v12, %v499_v14 }
 0x199   : > { %v501_v18 = vadd.f32 %v898_v12, %v500_v16 }
 0x19b   : > { %v505_v20 = vsel %vm504_vm6, %v898_v12, %v501_v18 }
 0x19c   : > { %v510_v21 = vsel %vm507_vm7, %v509_v19, %v505_v20 }
 0x19d   : > { %v512_v23 = vmul.f32 %v510_v21, %v490_v8 }
 0x19f   : > { %v513_v24 = vmul.f32 %v512_v23, %v454_v22 }
 0x1a1   : > { %547 = vmatmul.f32.vlgmr.msra.gmra.mxu2 %v513_v24 }
 0x223   : > { %556 = sbr.rel (%p751_p0) target bundleno = 562 (0x232), region = 68 }
 0x224   : > { %v548_v26 = vpop.f32.mrf.mxu2 }
 0x225   : > { %v551_v27 = vadd.f32 %v548_v26, %v514_v25 }
 0x227   : > { %552 = vst [vmem:[#allocation3] sm:$0xff] %v551_v27 }
 0x228   : > { %v558_v29 = vld [vmem:[%s306_s10] sm:$0xff] }
 0x22e   : > { %v557_v28 = vld [vmem:[#allocation3] sm:$0xff] }
 0x22f   : > { %v559_v30 = vadd.f32 %v558_v29, %v557_v28 }
 0x231   : > { %560 = vst [vmem:[%s383_s17] sm:$0xff] %v559_v30 }
 0x232 PF: > { %s753_s0 = sshll.u32 %s1167_s25, 3  ;;  %s1586_s13 = sld [smem:[#allocation26_spill]] }
 0x233   : > { %s574_s24 = sshll.u32 %s383_s17, 4  ;;  %s562_s5 = scalar_lea.sflag [#allocation6], %s304_s6  ;;  %s575_s24 = int_to_ptr.vmem [resolvable:$true] %s574_s24 }
 0x238   : > { %s572_s9 = scalar_lea.hbm %s1586_s13, %s753_s0  ;;  %s1069_s10 = scalar_lea.hbm %s1586_s13, 16 }
 0x239   : > { %s576_s16 = sshll.u32 %s572_s9, 4  ;;  %s577_s16 = int_to_ptr.hbm [resolvable:$true] %s576_s16 }
 0x23a   : > { %s1063_s11 = sshra.s32 %s577_s16, 4  ;;  %s1064_s11 = int_to_ptr.hbm [resolvable:$true] %s1063_s11 }
 0x23b   : > { %s1065_s14 = scalar_lea.hbm %s1064_s11, 8  ;;  %p1070_p6 = scmp.lt.s32.totalorder %s1064_s11, %s1586_s13 }
 0x23c   : > { %p1066_p2 = scmp.ne.s32.totalorder %s1064_s11, %s1065_s14  ;;  %p1071_p7 = scmp.lt.s32.totalorder %s1069_s10, %s1065_s14 }
 0x23e   : > { %p1067_p4 = pnand %p1066_p2, %p1384_p10  ;;  %p1072_p8 = por %p1071_p7, %p1070_p6 }
 0x240   : > { %p1068_p5 = pneg %p1067_p4 }
 0x242   : > { %p1073_p9 = pnand %p1072_p8, %p1068_p5 }
 0x244   : > { %1076 = shalt.err (!%p1073_p9)
}
 0x245   : > { %769 = dma.vmem_to_hbm [thread:$0]  (%p1384_p10), %s575_s24, 128, %s577_s16, %s562_s5  }
 0x246 PF: > { %p795_p12 = scmp.ge.s32.totalorder %s1179_s28, 2  ;;  %s588_s6 = sand.u32 1, %s1151_s21  }
 0x247   : > { %s589_s8 = scalar_lea.sflag [#allocation6], %s588_s6 }
 0x248   : > { %p789_p3 = pnand %p795_p12, %p1313_p11 }
 0x24a   : > { %p790_p1 = pneg %p789_p3 }
 0x24c   : > { %1134 = dma.done.wait (%p790_p1), %s589_s8, 128  }
 0x24d   : > { %1136 = vsyncadd (%p790_p1), %s589_s8, 4294967168  ;;  %s22_s28 = sadd.s32 1, %s1179_s28   ;;  %s1587_s3 = sld [smem:[#allocation20_spill]] }
 0x24e   : > { %p19_p13 = scmp.ge.s32.totalorder %s22_s28, 6   ;;  %s1588_s27 = sld [smem:[#allocation21_spill]] }
 0x24f   : > { %s1589_s25 = sld [smem:[#allocation17_spill]]  ;;  %s1592_s18 = smov %s1143_s19 }
 0x250   : > { %s1590_s7 = sld [smem:[#allocation18_spill]]  ;;  %s1593_s19 = smov %s1147_s20 }
 0x251   : > { %s1591_s17 = sld [smem:[#allocation19_spill]]  ;;  %s1595_s21 = smov %s1155_s22 }
 0x252   : > { %s1596_s22 = smov %s1159_s23  ;;  %s1598_s24 = smov %s1171_s26 }
 0x253   : > { %s1594_s20 = smov %s1587_s3  ;;  %21 = sbr.rel (!%p19_p13) target bundleno = 16 (0x10), region = 130 }
 0x254   : > { %s1597_s23 = smov %s1588_s27 }
 0x256   : > { %s1599_s26 = smov %s1590_s7 }
 0x257   : > { %s1600_s27 = smov %s1591_s17 }
 0x258   :  { %595 = vsyncpa [#allocation5], 1 }
 0x259   :  { %597 = vsyncpa [#allocation5 + $0x1], 1 }
 0x25a   :  { %598 = vsyncpa [#allocation8], 1 }
 0x25b   :  { %599 = vsyncpa [#allocation6], 1 }
 0x25c   :  { %601 = vsyncpa [#allocation6 + $0x1], 1 }

</bundles_post_ra>
